<compile_context>
chip_gen: v5e
topology: v5e:2x2
jax: 0.10.0
libtpu: 0.0.40
codegen_flags: <defaults>
</compile_context>

<pallas_src>
import functools

import jax
import jax.numpy as jnp
from jax import lax
from jax.experimental import pallas as pl
from jax.experimental.pallas import tpu as pltpu


def _node_update_kernel(h_ref, w_ref, o_ref, *, alpha):
    # h_ref: (TM, in_feats), w_ref: (out_feats, in_feats)  →  (TM, out_feats)
    # Contract h dim 1 with w dim 1 (== h @ W.T) — MXU handles the transposed
    # contraction natively, no separate transpose pass over the weight.
    y = lax.dot_general(
        h_ref[...],
        w_ref[...],
        dimension_numbers=(((1,), (1,)), ((), ())),
        preferred_element_type=jnp.float32,
    )
    # Fused LeakyReLU (matches torch: y if y >= 0 else alpha * y).
    y = jnp.where(y >= 0.0, y, alpha * y)
    o_ref[...] = y.astype(o_ref.dtype)


def anee_node_update(h, w, alpha=0.01, *, tm_max=512):
    """Pallas equivalent of ANEENodeUpdate.forward.

    Args:
      h: (N, in_feats) node features.
      w: (out_feats, in_feats) weight, same convention as torch.nn.Linear.weight.
      alpha: LeakyReLU negative slope.
      tm_max: max node-tile height (rows per grid step).

    Returns:
      (N, out_feats) updated node features.
    """
    n, in_feats = h.shape
    out_feats, in_feats_w = w.shape
    assert in_feats == in_feats_w

    # Row tile: full array if small (always legal), else a multiple of 8 so the
    # compiler emits unmasked vld/vst on full tiles; the final remainder tile
    # is masked automatically by Pallas.
    if n <= tm_max:
        tm = n
    else:
        tm = tm_max  # multiple of 8 by construction (512)
    grid = (pl.cdiv(n, tm),)

    dtype_bytes = jnp.dtype(h.dtype).itemsize
    # VMEM budget: resident weight + double-buffered h/out tiles, with headroom.
    needed = dtype_bytes * (
        out_feats * in_feats          # resident weight
        + 2 * tm * in_feats           # double-buffered h tiles
        + 2 * tm * out_feats          # double-buffered out tiles
    )
    vmem_limit = int(min(max(2 * needed, 32 << 20), 64 << 20))

    cost = pl.CostEstimate(
        flops=2 * n * in_feats * out_feats,
        bytes_accessed=dtype_bytes * (n * in_feats + in_feats * out_feats + n * out_feats),
        transcendentals=0,
    )

    kernel = functools.partial(_node_update_kernel, alpha=alpha)

    return pl.pallas_call(
        kernel,
        out_shape=jax.ShapeDtypeStruct((n, out_feats), h.dtype),
        grid_spec=pltpu.PrefetchScalarGridSpec(
            num_scalar_prefetch=0,
            grid=grid,
            in_specs=[
                # Node tile: marches down the row axis.
                pl.BlockSpec((tm, in_feats), lambda i: (i, 0)),
                # Weight: same block every step → VMEM-resident, loaded once.
                pl.BlockSpec((out_feats, in_feats), lambda i: (0, 0)),
            ],
            out_specs=pl.BlockSpec((tm, out_feats), lambda i: (i, 0)),
        ),
        compiler_params=pltpu.CompilerParams(
            dimension_semantics=("parallel",),   # shards rows across TCs on v7x
            vmem_limit_bytes=vmem_limit,
        ),
        cost_estimate=cost,
    )(h, w)

# TODO(synk): if in_feats grows to multi-thousand, add a K grid axis
# ("arbitrary", last) with an f32 VMEM accumulator; unnecessary at these widths.


def reference(h, w, alpha=0.01):
    y = h @ w.T
    return jnp.where(y >= 0.0, y, alpha * y)


if __name__ == "__main__":
    key = jax.random.PRNGKey(0)

    # Small shapes consistent with the module: N nodes, in_feats -> out_feats.
    n, in_feats, out_feats = 8, 32, 32
    alpha = 0.01

    k_h, k_w, k_h2, k_w2 = jax.random.split(key, 4)
    h = jax.random.normal(k_h, (n, in_feats), dtype=jnp.float32)
    # Deterministic "parameter init" mimicking nn.Linear's uniform init bound.
    bound = 1.0 / (in_feats ** 0.5)
    w = jax.random.uniform(
        k_w, (out_feats, in_feats), dtype=jnp.float32, minval=-bound, maxval=bound
    )

    out = anee_node_update(h, w, alpha=alpha)
    out = jax.block_until_ready(out)
    ref = reference(h, w, alpha=alpha)
    assert out.shape == (n, out_feats)
    assert jnp.allclose(out, ref, atol=1e-5, rtol=1e-5)

    # Second check: exercises row tiling + a remainder tile (1040 = 2*512 + 16)
    # with lane-dense 128-wide features.
    n2, in2, out2 = 1040, 128, 128
    h2 = jax.random.normal(k_h2, (n2, in2), dtype=jnp.float32)
    bound2 = 1.0 / (in2 ** 0.5)
    w2 = jax.random.uniform(
        k_w2, (out2, in2), dtype=jnp.float32, minval=-bound2, maxval=bound2
    )
    out2_arr = anee_node_update(h2, w2, alpha=alpha)
    out2_arr = jax.block_until_ready(out2_arr)
    ref2 = reference(h2, w2, alpha=alpha)
    assert out2_arr.shape == (n2, out2)
    assert jnp.allclose(out2_arr, ref2, atol=1e-4, rtol=1e-4)

    print("KERNEL_OK")
</pallas_src>

<mosaic_0001>
module attributes {stable_mosaic.version = 11 : i64} {
  func.func @_node_update_kernel(%arg0: i32, %arg1: memref<8x32xf32, #tpu.memory_space<vmem>>, %arg2: memref<32x32xf32, #tpu.memory_space<vmem>>, %arg3: memref<8x32xf32, #tpu.memory_space<vmem>>) attributes {dimension_semantics = [#tpu.dimension_semantics<parallel>], iteration_bounds = array<i64: 1>, scalar_prefetch = 0 : i64, scratch_operands = 0 : i64, tpu.core_type = #tpu.core_type<tc>, window_params = [{transform_indices = @transform_0, window_bounds = array<i64: 8, 32>}, {pipeline_mode = #tpu.pipeline_mode<synchronous>, transform_indices = @transform_1, window_bounds = array<i64: 32, 32>}, {transform_indices = @transform_2, window_bounds = array<i64: 8, 32>}]} {
    %c0 = arith.constant 0 : index
    %c0_0 = arith.constant 0 : index
    %0 = vector.load %arg1[%c0, %c0_0] : memref<8x32xf32, #tpu.memory_space<vmem>>, vector<8x32xf32>
    %c0_1 = arith.constant 0 : index
    %c0_2 = arith.constant 0 : index
    %1 = vector.load %arg2[%c0_1, %c0_2] : memref<32x32xf32, #tpu.memory_space<vmem>>, vector<32x32xf32>
    %cst = arith.constant dense<0.000000e+00> : vector<8x32xf32>
    %2 = tpu.matmul %0, %1, %cst {dimension_numbers = #tpu.dot_dimension_numbers<[1], [1], [0], [0], [0, 0, 1, 0], [], []>} : vector<8x32xf32>, vector<32x32xf32>, vector<8x32xf32> -> vector<8x32xf32>
    %cst_3 = arith.constant 0.000000e+00 : f32
    %3 = vector.broadcast %cst_3 : f32 to vector<8x32xf32>
    %4 = arith.cmpf oge, %2, %3 : vector<8x32xf32>
    %cst_4 = arith.constant 0.00999999977 : f32
    %5 = vector.broadcast %cst_4 : f32 to vector<8x32xf32>
    %6 = arith.mulf %5, %2 : vector<8x32xf32>
    %7 = arith.select %4, %2, %6 : vector<8x32xi1>, vector<8x32xf32>
    %c0_5 = arith.constant 0 : index
    %c0_6 = arith.constant 0 : index
    %8 = vector.load %arg3[%c0_5, %c0_6] : memref<8x32xf32, #tpu.memory_space<vmem>>, vector<8x32xf32>
    tpu.vector_store %arg3[%c0_5, %c0_6], %7 {strides = array<i32>} : memref<8x32xf32, #tpu.memory_space<vmem>>, vector<8x32xf32>,
    return
  }
  func.func @transform_0(%arg0: i32) -> (i32, i32) {
    %c0_i32 = arith.constant 0 : i32
    %c0_i32_0 = arith.constant 0 : i32
    return %arg0, %c0_i32 : i32, i32
  }
  func.func @transform_1(%arg0: i32) -> (i32, i32) {
    %c0_i32 = arith.constant 0 : i32
    %c0_i32_0 = arith.constant 0 : i32
    %c0_i32_1 = arith.constant 0 : i32
    return %c0_i32, %c0_i32_0 : i32, i32
  }
  func.func @transform_2(%arg0: i32) -> (i32, i32) {
    %c0_i32 = arith.constant 0 : i32
    %c0_i32_0 = arith.constant 0 : i32
    return %arg0, %c0_i32 : i32, i32
  }
}

</mosaic_0001>

<bundles_post_ra>
// kernel: tpu_custom_call.1
= control target key start
LH: loop header
LB: loop body
LE: loop exit
PB: predicated region body
PF: predicated region fallthrough
CT: control target
= control target key end

     0   :  { %7 = vsyncpa [#allocation3], 0  ;;  %s228_s0 = inlined_call_operand.hbm [shape: f32[8,32], index: 0, kind: input, shape index: {}]   ;;  %s229_s1 = inlined_call_operand.hbm [shape: f32[32,32], index: 1, kind: input, shape index: {}]   ;;  %s230_s2 = inlined_call_operand.hbm [shape: f32[8,32], index: 2, kind: output, shape index: {}]  }
   0x1   :  { %8 = vsyncpa [#allocation6], 0 }
   0x2   :  { %9 = vsyncpa [#allocation4], 0  ;;  %s15_s11 = sshll.u32 %s228_s0, 4  ;;  %s193_s12 = smov [#allocation2]   ;;  %s16_s11 = int_to_ptr.hbm [resolvable:$true] %s15_s11 }
   0x3   :  { %s17_s13 = sshll.u32 %s193_s12, 4  ;;  %s25_s16 = sshll.u32 %s229_s1, 4  ;;  %s18_s13 = int_to_ptr.vmem [resolvable:$true] %s17_s13  ;;  %s26_s16 = int_to_ptr.hbm [resolvable:$true] %s25_s16 }
   0x4   :  { %20 = dma.hbm_to_vmem [thread:$0]  %s16_s11, 128, %s18_s13, [#allocation3]  }
   0x5   :  { %s194_s17 = smov [#allocation5]   ;;  %s195_s19 = smov 128  }
   0x6   :  { %s27_s18 = sshll.u32 %s194_s17, 4  ;;  %s196_s20 = smov 8   ;;  %s28_s18 = int_to_ptr.vmem [resolvable:$true] %s27_s18 }
   0x7   :  { %33 = dma.hbm_to_vmem [thread:$0]  %s26_s16, 512, %s28_s18, [#allocation6], %s195_s19, %s195_s19, %s196_s20  }
   0x8   :  { %187 = dma.done.wait [#allocation3], 128  }
   0x9   :  { %188 = vsyncadd [#allocation3], 4294967168 }
   0xa   :  { %189 = dma.done.wait [#allocation6], 512  }
   0xb   :  { %190 = vsyncadd [#allocation6], 4294966784  ;;  %vm47_vm0 = vcmask 261120   ;;  %v46_v0 = vld [vmem:[#allocation5 + $0x18] sm:$0xff]  ;;  %v45_v1 = vld [vmem:[#allocation5 + $0x10] sm:$0xff]  ;;  %s197_s0 = smov [#allocation7]  }
   0xc   :  { %105 = vmatpush.xpose.msk.msra.mxu0 %vm47_vm0, %v46_v0  ;;  %v44_v2 = vld [vmem:[#allocation5 + $0x8] sm:$0xff]  ;;  %v43_v3 = vld [vmem:[#allocation5] sm:$0xff]  ;;  %v42_v4 = vld [vmem:[#allocation2] sm:$0xff]  ;;  %s92_s1 = sshll.u32 %s197_s0, 4  ;;  %s94_s23 = sshll.u32 %s230_s2, 4  ;;  %s93_s1 = int_to_ptr.vmem [resolvable:$true] %s92_s1  ;;  %s95_s23 = int_to_ptr.hbm [resolvable:$true] %s94_s23 }
  0x10   :  { %106 = vmatpush.xpose.msk.msra.mxu0 %vm47_vm0, %v45_v1 }
  0x14   :  { %107 = vmatpush.xpose.msk.msra.mxu0 %vm47_vm0, %v44_v2 }
  0x18   :  { %108 = vmatpush.xpose.msk.msra.mxu0 %vm47_vm0, %v43_v3 }
  0x1b   :  { %109 = vmatmul.msk.f32.vlgmr.msra.gmra.mxu0 %vm47_vm0, %v42_v4 }
  0x98   :  { %v80_v5 = vpop.f32.mrf.mxu0 }
  0x99   :  { %vm83_vm1 = vcmp.ge.f32.partialorder %v80_v5, 0.0  ;;  %v84_v6 = vmul.f32 0.01, %v80_v5 }
  0x9b   :  { %v85_v7 = vsel %vm83_vm1, %v80_v5, %v84_v6 }
  0x9c   :  { %86 = vst.msk [vmem:[#allocation7] sm:$0xff] %vm47_vm0, %v85_v7 }
  0x9d   :  { %97 = dma.vmem_to_hbm [thread:$0]  %s93_s1, 128, %s95_s23, [#allocation4]  }
  0x9e   :  { %191 = dma.done.wait [#allocation4], 128  }
  0x9f   :  { %192 = vsyncadd [#allocation4], 4294967168 }
  0xa0   :  { %102 = vsyncpa [#allocation3], 1 }
  0xa1   :  { %103 = vsyncpa [#allocation6], 1 }
  0xa2   :  { %104 = vsyncpa [#allocation4], 1 }

</bundles_post_ra>
